<compile_context>
chip_gen: v5e
topology: v5e:2x2
jax: 0.10.0
libtpu: 0.0.40
codegen_flags: <defaults>
</compile_context>

<pallas_src>
import math
import functools

import jax
import jax.numpy as jnp
from jax import lax
from jax.experimental import pallas as pl
from jax.experimental.pallas import tpu as pltpu


_LN_EPS = 1e-5
_NEG_INF = -1e30   # large finite negative: no inf arithmetic in the masked softmax


def _layernorm_f32(x, g_ref, b_ref):
    """LayerNorm in f32; gamma/beta refs are (1, D) and broadcast."""
    mean = jnp.mean(x, axis=-1, keepdims=True)
    var = jnp.mean((x - mean) ** 2, axis=-1, keepdims=True)  # biased, like torch LayerNorm
    return (x - mean) * lax.rsqrt(var + _LN_EPS) * g_ref[...].astype(jnp.float32) \
        + b_ref[...].astype(jnp.float32)


def _gelu_tanh(x):
    c = math.sqrt(2.0 / math.pi)
    return 0.5 * x * (1.0 + jnp.tanh(c * (x + 0.044715 * x * x * x)))


# ----------------------------------------------------------------------------
# Kernel 1: LayerNorm1 + fused QKV projection  (grid: (B, T//block_t))
# ----------------------------------------------------------------------------
def _ln_qkv_kernel(x_ref, g_ref, b_ref, wqkv_ref, bqkv_ref, q_ref, k_ref, v_ref):
    x = x_ref[0].astype(jnp.float32)                       # (bt, D)
    h = _layernorm_f32(x, g_ref, b_ref)
    # One fused (bt, D) @ (D, 3D) MXU matmul instead of three.
    qkv = jnp.dot(h.astype(wqkv_ref.dtype), wqkv_ref[...],
                  preferred_element_type=jnp.float32)
    qkv = qkv + bqkv_ref[...].astype(jnp.float32)          # (bt, 3D)
    D = x.shape[-1]
    # Three full-width, lane-dense stores (no per-head masked stores).
    q_ref[0] = qkv[:, 0 * D:1 * D].astype(q_ref.dtype)
    k_ref[0] = qkv[:, 1 * D:2 * D].astype(k_ref.dtype)
    v_ref[0] = qkv[:, 2 * D:3 * D].astype(v_ref.dtype)


# ----------------------------------------------------------------------------
# Kernel 2: causal flash attention + output projection + residual
#           (grid: (B, T//block_q, T//block_kv); kv axis is "arbitrary")
# ----------------------------------------------------------------------------
def _attn_kernel(q_ref, k_ref, v_ref, x_ref, wo_ref, bo_ref, o_ref,
                 q_sc, m_sc, l_sc, acc_sc, *,
                 num_heads, block_q, block_kv, p_dtype, approx_recip):
    qi = pl.program_id(1)
    ki = pl.program_id(2)
    H = num_heads
    hd = q_sc.shape[-1]

    @pl.when(ki == 0)
    def _init():
        m_sc[...] = jnp.full(m_sc.shape, _NEG_INF, m_sc.dtype)
        l_sc[...] = jnp.zeros(l_sc.shape, l_sc.dtype)
        acc_sc[...] = jnp.zeros(acc_sc.shape, acc_sc.dtype)
        # Split Q heads once per q tile (scale already folded into Wq on host).
        q2d = q_ref[0]                                     # (bq, D), lane-dense load
        q_sc[...] = jnp.stack([q2d[:, h * hd:(h + 1) * hd] for h in range(H)], axis=0)

    q_first = qi * block_q
    q_last = q_first + (block_q - 1)
    kv_first = ki * block_kv
    kv_last = kv_first + (block_kv - 1)

    def _update(masked):
        k2d = k_ref[0]                                     # (bkv, D) lane-dense
        v2d = v_ref[0]
        k_h = jnp.stack([k2d[:, h * hd:(h + 1) * hd] for h in range(H)], axis=0)
        v_h = jnp.stack([v2d[:, h * hd:(h + 1) * hd] for h in range(H)], axis=0)
        # Heads batched in a single MXU einsum (no per-head matmul loop).
        s = jnp.einsum("hqd,hkd->hqk", q_sc[...], k_h,
                       preferred_element_type=jnp.float32)  # (H, bq, bkv) f32
        if masked:
            rows = q_first + lax.broadcasted_iota(jnp.int32, (block_q, block_kv), 0)
            cols = kv_first + lax.broadcasted_iota(jnp.int32, (block_q, block_kv), 1)
            s = jnp.where((cols <= rows)[None, :, :], s, _NEG_INF)

        m_prev = m_sc[...]
        m_new = jnp.maximum(m_prev, jnp.max(s, axis=-1, keepdims=True))
        alpha = jnp.exp(m_prev - m_new)
        # exp in the compute dtype (bf16 on v6e/v7x) relieves the EUP; stats stay f32.
        p = jnp.exp((s - m_new).astype(p_dtype))
        l_sc[...] = alpha * l_sc[...] + jnp.sum(p, axis=-1, keepdims=True,
                                                dtype=jnp.float32)
        acc_sc[...] = alpha * acc_sc[...] + jnp.einsum(
            "hqk,hkd->hqd", p.astype(v_h.dtype), v_h,
            preferred_element_type=jnp.float32)
        m_sc[...] = m_new

    # Fully below the diagonal: no mask arithmetic needed.
    @pl.when(kv_last <= q_first)
    def _unmasked():
        _update(masked=False)

    # Straddling the diagonal: build and apply the causal mask.
    @pl.when(jnp.logical_and(kv_last > q_first, kv_first <= q_last))
    def _masked():
        _update(masked=True)
    # Fully above the diagonal: skipped entirely; the clamped K/V index_map also
    # elides the DMA for these blocks.
    # Correctness note: the kv iteration always starts at ki==0, which contains a
    # valid (unmasked) column for every row, so m/l are finite before any block
    # whose rows are fully masked can occur (exp(-1e30 - m) underflows to 0).

    @pl.when(ki == pl.num_programs(2) - 1)
    def _finalize():
        inv_l = pl.reciprocal(l_sc[...], approx=approx_recip)    # EUP slot
        ctx = acc_sc[...] * inv_l                                # (H, bq, hd) f32
        wo = wo_ref[...]
        out = x_ref[0].astype(jnp.float32) + bo_ref[...].astype(jnp.float32)
        # Per-head Wo accumulation: concat_h(ctx) @ Wo == sum_h ctx[h] @ Wo[h*hd:(h+1)*hd].
        # Avoids the H-way lane-offset concat / relayout of the previous version.
        for h in range(H):
            out = out + jnp.dot(ctx[h].astype(wo.dtype),
                                wo[h * hd:(h + 1) * hd, :],
                                preferred_element_type=jnp.float32)
        o_ref[0] = out.astype(o_ref.dtype)


# ----------------------------------------------------------------------------
# Kernel 3: LayerNorm2 + FFN (Dff tiled) + residual
#           (grid: (B, T//block_t, Dff//block_ff); ff axis is "arbitrary")
# ----------------------------------------------------------------------------
def _ln_ffn_kernel(x_ref, g_ref, b_ref, w1_ref, b1_ref, w2_ref, b2_ref,
                   o_ref, h_sc, acc_sc):
    f = pl.program_id(2)

    @pl.when(f == 0)
    def _init():
        x = x_ref[0].astype(jnp.float32)
        h_sc[...] = _layernorm_f32(x, g_ref, b_ref).astype(h_sc.dtype)
        acc_sc[...] = jnp.zeros(acc_sc.shape, acc_sc.dtype)

    # (bt, D) @ (D, bff) -> GELU -> (bt, bff) @ (bff, D), accumulated over Dff
    # tiles so W1/W2 never need to be fully resident in VMEM.
    t = jnp.dot(h_sc[...], w1_ref[...], preferred_element_type=jnp.float32)
    t = _gelu_tanh(t + b1_ref[...].astype(jnp.float32))
    acc_sc[...] += jnp.dot(t.astype(w2_ref.dtype), w2_ref[...],
                           preferred_element_type=jnp.float32)

    @pl.when(f == pl.num_programs(2) - 1)
    def _finalize():
        o_ref[0] = (x_ref[0].astype(jnp.float32) + acc_sc[...]
                    + b2_ref[...].astype(jnp.float32)).astype(o_ref.dtype)


# ----------------------------------------------------------------------------
# Wrapper
# ----------------------------------------------------------------------------
def _default_vmem_limit_bytes():
    cap = 128 * 1024 * 1024
    try:
        cap = pltpu.get_tpu_info().vmem_capacity_bytes
    except Exception:
        pass
    # ~3/4 of physical: 96 MiB on the 128 MiB parts (v5e/v6e), 48 MiB on v7x.
    return min(96 * 1024 * 1024, (3 * cap) // 4)


def transformer_block(x, params, num_heads, *,
                      block_t=None, block_q=None, block_kv=None, block_ff=None,
                      compute_dtype=jnp.bfloat16, vmem_limit_bytes=None):
    """GPT-2 TransformerBlock forward (inference; dropout = identity)."""
    B, T, D = x.shape
    Dff = params["w1"].shape[1]
    assert D % num_heads == 0
    hd = D // num_heads

    if block_t is None:
        block_t = min(T, 256)     # M=256 fills the 256-wide MXU on v6e/v7x
    if block_q is None:
        block_q = min(T, 256)
    if block_kv is None:
        block_kv = min(T, 256)
    if block_ff is None:
        block_ff = min(Dff, 1024)
    assert T % block_t == 0 and T % block_q == 0 and T % block_kv == 0
    assert Dff % block_ff == 0
    nt, nq, nkv, nff = T // block_t, T // block_q, T // block_kv, Dff // block_ff

    if vmem_limit_bytes is None:
        vmem_limit_bytes = _default_vmem_limit_bytes()

    cdt = compute_dtype
    f32 = jnp.float32

    # Host-side parameter prep (done once):
    #  * fuse Wq|Wk|Wv into one (D, 3D) weight -> single MXU matmul in-kernel
    #  * fold 1/sqrt(head_dim) into Wq/bq (zero in-kernel cost)
    #  * cast weights to compute_dtype (bf16); accumulate in f32 in-kernel
    sm_scale = 1.0 / math.sqrt(hd)
    wqkv = jnp.concatenate(
        [params["wq"] * sm_scale, params["wk"], params["wv"]], axis=1).astype(cdt)
    bqkv = jnp.concatenate(
        [params["bq"] * sm_scale, params["bk"], params["bv"]], axis=1).astype(f32)
    wo, bo = params["wo"].astype(cdt), params["bo"].astype(f32)
    w1, b1 = params["w1"].astype(cdt), params["b1"].astype(f32)
    w2, b2 = params["w2"].astype(cdt), params["b2"].astype(f32)
    ln1_g, ln1_b = params["ln1_g"].astype(f32), params["ln1_b"].astype(f32)
    ln2_g, ln2_b = params["ln2_g"].astype(f32), params["ln2_b"].astype(f32)

    # Residual / activation stream carried in compute dtype between kernels.
    x_c = x.astype(cdt)

    def cparams(sem):
        return pltpu.CompilerParams(dimension_semantics=sem,
                                    vmem_limit_bytes=vmem_limit_bytes)

    # ---- kernel 1: LayerNorm1 + fused QKV projection (lane-dense outputs) ----
    q, k, v = pl.pallas_call(
        _ln_qkv_kernel,
        out_shape=[jax.ShapeDtypeStruct((B, T, D), cdt)] * 3,
        grid=(B, nt),
        in_specs=[
            pl.BlockSpec((1, block_t, D), lambda b, t: (b, t, 0)),
            pl.BlockSpec((1, D), lambda b, t: (0, 0)),
            pl.BlockSpec((1, D), lambda b, t: (0, 0)),
            # TODO(synk): pipeline_mode=pl.Buffered(1) on the constant-indexed weight
            # specs would halve their VMEM on v7x; left default for API portability.
            pl.BlockSpec((D, 3 * D), lambda b, t: (0, 0)),
            pl.BlockSpec((1, 3 * D), lambda b, t: (0, 0)),
        ],
        out_specs=[pl.BlockSpec((1, block_t, D), lambda b, t: (b, t, 0))] * 3,
        compiler_params=cparams(("parallel", "parallel")),
    )(x_c, ln1_g, ln1_b, wqkv, bqkv)

    # ---- kernel 2: flash attention (K/V streamed) + Wo + residual ----
    def kv_index(b, i, j):
        # Clamp: causally-skipped kv blocks reuse the last valid block index so
        # Pallas elides their HBM DMA (~2x K/V bandwidth saved for causal).
        last_valid = ((i + 1) * block_q - 1) // block_kv
        return (b, jnp.minimum(j, last_valid), 0)

    x1 = pl.pallas_call(
        functools.partial(_attn_kernel, num_heads=num_heads, block_q=block_q,
                          block_kv=block_kv, p_dtype=cdt,
                          approx_recip=(cdt != jnp.float32)),
        out_shape=jax.ShapeDtypeStruct((B, T, D), cdt),
        grid=(B, nq, nkv),
        in_specs=[
            pl.BlockSpec((1, block_q, D), lambda b, i, j: (b, i, 0)),
            pl.BlockSpec((1, block_kv, D), kv_index),
            pl.BlockSpec((1, block_kv, D), kv_index),
            pl.BlockSpec((1, block_q, D), lambda b, i, j: (b, i, 0)),
            pl.BlockSpec((D, D), lambda b, i, j: (0, 0)),
            pl.BlockSpec((1, D), lambda b, i, j: (0, 0)),
        ],
        out_specs=pl.BlockSpec((1, block_q, D), lambda b, i, j: (b, i, 0)),
        scratch_shapes=[
            pltpu.VMEM((num_heads, block_q, hd), cdt),          # head-split Q cache
            pltpu.VMEM((num_heads, block_q, 1), jnp.float32),   # running max
            pltpu.VMEM((num_heads, block_q, 1), jnp.float32),   # running sum
            pltpu.VMEM((num_heads, block_q, hd), jnp.float32),  # ctx accumulator
        ],
        compiler_params=cparams(("parallel", "parallel", "arbitrary")),
    )(q, k, v, x_c, wo, bo)

    # ---- kernel 3: LayerNorm2 + FFN (Dff tiled) + residual -----------------
    out = pl.pallas_call(
        _ln_ffn_kernel,
        out_shape=jax.ShapeDtypeStruct((B, T, D), cdt),
        grid=(B, nt, nff),
        in_specs=[
            pl.BlockSpec((1, block_t, D), lambda b, t, f: (b, t, 0)),
            pl.BlockSpec((1, D), lambda b, t, f: (0, 0)),
            pl.BlockSpec((1, D), lambda b, t, f: (0, 0)),
            pl.BlockSpec((D, block_ff), lambda b, t, f: (0, f)),
            pl.BlockSpec((1, block_ff), lambda b, t, f: (0, f)),
            pl.BlockSpec((block_ff, D), lambda b, t, f: (f, 0)),
            pl.BlockSpec((1, D), lambda b, t, f: (0, 0)),
        ],
        out_specs=pl.BlockSpec((1, block_t, D), lambda b, t, f: (b, t, 0)),
        scratch_shapes=[
            pltpu.VMEM((block_t, D), cdt),           # LN2 output, reused over Dff tiles
            pltpu.VMEM((block_t, D), jnp.float32),   # FFN accumulator
        ],
        compiler_params=cparams(("parallel", "parallel", "arbitrary")),
    )(x1, ln2_g, ln2_b, w1, b1, w2, b2)

    return out


# ----------------------------------------------------------------------------
# Pure-JAX f32 reference (same math as the PyTorch module, eval mode)
# ----------------------------------------------------------------------------
def reference_block(x, p, num_heads):
    eps = 1e-5
    B, T, D = x.shape
    hd = D // num_heads

    def ln(v, g, b):
        m = jnp.mean(v, -1, keepdims=True)
        var = jnp.mean((v - m) ** 2, -1, keepdims=True)
        return (v - m) / jnp.sqrt(var + eps) * g + b

    h = ln(x, p["ln1_g"], p["ln1_b"])
    q = h @ p["wq"] + p["bq"]
    k = h @ p["wk"] + p["bk"]
    v = h @ p["wv"] + p["bv"]
    q = q.reshape(B, T, num_heads, hd).transpose(0, 2, 1, 3)
    k = k.reshape(B, T, num_heads, hd).transpose(0, 2, 1, 3)
    v = v.reshape(B, T, num_heads, hd).transpose(0, 2, 1, 3)
    s = jnp.einsum("bhqd,bhkd->bhqk", q, k) / math.sqrt(hd)
    mask = jnp.tril(jnp.ones((T, T), bool))
    s = jnp.where(mask, s, -jnp.inf)
    a = jax.nn.softmax(s, axis=-1)
    ctx = jnp.einsum("bhqk,bhkd->bhqd", a, v).transpose(0, 2, 1, 3).reshape(B, T, D)
    x1 = x + (ctx @ p["wo"] + p["bo"])
    h2 = ln(x1, p["ln2_g"], p["ln2_b"])
    f = h2 @ p["w1"] + p["b1"]
    f = 0.5 * f * (1.0 + jnp.tanh(jnp.sqrt(2.0 / jnp.pi) * (f + 0.044715 * f ** 3)))
    f = f @ p["w2"] + p["b2"]
    return x1 + f


# ----------------------------------------------------------------------------
# Main
# ----------------------------------------------------------------------------
if __name__ == "__main__":
    cfg = dict(emb_dim=32, context_length=8, n_heads=4, drop_rate=0.0, qkv_bias=True)
    B, T, D = 2, cfg["context_length"], cfg["emb_dim"]
    Dff = 4 * D

    root = jax.random.PRNGKey(0)
    keys = jax.random.split(root, 13)

    def winit(k, shape, fan_in):
        return jax.random.normal(k, shape, jnp.float32) / math.sqrt(fan_in)

    params = {
        "ln1_g": jnp.ones((1, D), jnp.float32),
        "ln1_b": jnp.zeros((1, D), jnp.float32),
        "wq": winit(keys[0], (D, D), D),
        "bq": 0.01 * jax.random.normal(keys[1], (1, D), jnp.float32),
        "wk": winit(keys[2], (D, D), D),
        "bk": 0.01 * jax.random.normal(keys[3], (1, D), jnp.float32),
        "wv": winit(keys[4], (D, D), D),
        "bv": 0.01 * jax.random.normal(keys[5], (1, D), jnp.float32),
        "wo": winit(keys[6], (D, D), D),
        "bo": 0.01 * jax.random.normal(keys[7], (1, D), jnp.float32),
        "ln2_g": jnp.ones((1, D), jnp.float32),
        "ln2_b": jnp.zeros((1, D), jnp.float32),
        "w1": winit(keys[8], (D, Dff), D),
        "b1": 0.01 * jax.random.normal(keys[9], (1, Dff), jnp.float32),
        "w2": winit(keys[10], (Dff, D), Dff),
        "b2": 0.01 * jax.random.normal(keys[11], (1, D), jnp.float32),
    }
    x = jax.random.normal(keys[12], (B, T, D), jnp.float32)

    ref = jax.block_until_ready(reference_block(x, params, cfg["n_heads"]))

    # f32-compute path: tight check of the blocked / flash-softmax restructuring.
    out_f32 = jax.block_until_ready(
        transformer_block(x, params, cfg["n_heads"], compute_dtype=jnp.float32))
    assert out_f32.shape == (B, T, D)
    assert jnp.allclose(out_f32, ref, atol=5e-4, rtol=5e-4), "f32 path mismatch vs reference"

    # Default mixed-precision path (bf16 weights/activations/residual stream,
    # f32 accumulation): looser tolerance vs. the f32 reference is expected.
    out = jax.block_until_ready(transformer_block(x, params, cfg["n_heads"]))
    assert out.shape == (B, T, D)
    assert jnp.allclose(out.astype(jnp.float32), ref, atol=1e-1, rtol=1e-1), \
        "bf16 path mismatch vs reference"

    # TODO(synk): nn.Dropout is modeled as identity (inference mode); training-mode
    # stochastic dropout would use pltpu.prng_seed / pltpu.stateful_bernoulli.
    print("KERNEL_OK")
</pallas_src>

<mosaic_0001>
module attributes {stable_mosaic.version = 11 : i64} {
  func.func @_ln_qkv_kernel(%arg0: i32, %arg1: i32, %arg2: memref<1x8x32xf32, #tpu.memory_space<vmem>>, %arg3: memref<1x32xf32, #tpu.memory_space<vmem>>, %arg4: memref<1x32xf32, #tpu.memory_space<vmem>>, %arg5: memref<32x96xf32, #tpu.memory_space<vmem>>, %arg6: memref<1x96xf32, #tpu.memory_space<vmem>>, %arg7: memref<1x8x32xf32, #tpu.memory_space<vmem>>, %arg8: memref<1x8x32xf32, #tpu.memory_space<vmem>>, %arg9: memref<1x8x32xf32, #tpu.memory_space<vmem>>) attributes {dimension_semantics = [#tpu.dimension_semantics<parallel>, #tpu.dimension_semantics<parallel>], iteration_bounds = array<i64: 2, 1>, scalar_prefetch = 0 : i64, scratch_operands = 0 : i64, tpu.core_type = #tpu.core_type<tc>, window_params = [{transform_indices = @transform_0, window_bounds = array<i64: 1, 8, 32>}, {pipeline_mode = #tpu.pipeline_mode<synchronous>, transform_indices = @transform_1, window_bounds = array<i64: 1, 32>}, {pipeline_mode = #tpu.pipeline_mode<synchronous>, transform_indices = @transform_2, window_bounds = array<i64: 1, 32>}, {pipeline_mode = #tpu.pipeline_mode<synchronous>, transform_indices = @transform_3, window_bounds = array<i64: 32, 96>}, {pipeline_mode = #tpu.pipeline_mode<synchronous>, transform_indices = @transform_4, window_bounds = array<i64: 1, 96>}, {transform_indices = @transform_5, window_bounds = array<i64: 1, 8, 32>}, {transform_indices = @transform_6, window_bounds = array<i64: 1, 8, 32>}, {transform_indices = @transform_7, window_bounds = array<i64: 1, 8, 32>}]} {
    %c0 = arith.constant 0 : index
    %c0_0 = arith.constant 0 : index
    %c0_1 = arith.constant 0 : index
    %0 = vector.load %arg2[%c0, %c0_0, %c0_1] : memref<1x8x32xf32, #tpu.memory_space<vmem>>, vector<1x8x32xf32>
    %1 = vector.shape_cast %0 : vector<1x8x32xf32> to vector<8x32xf32>
    %cst = arith.constant dense<0.000000e+00> : vector<8xf32>
    %2 = vector.multi_reduction <add>, %1, %cst [1] : vector<8x32xf32> to vector<8xf32>
    %3 = vector.shape_cast %2 : vector<8xf32> to vector<8x1xf32>
    %cst_2 = arith.constant 3.200000e+01 : f32
    %4 = vector.broadcast %cst_2 : f32 to vector<8x1xf32>
    %5 = arith.divf %3, %4 : vector<8x1xf32>
    %6 = vector.broadcast %5 : vector<8x1xf32> to vector<8x32xf32>
    %7 = arith.subf %1, %6 : vector<8x32xf32>
    %8 = arith.mulf %7, %7 : vector<8x32xf32>
    %cst_3 = arith.constant dense<0.000000e+00> : vector<8xf32>
    %9 = vector.multi_reduction <add>, %8, %cst_3 [1] : vector<8x32xf32> to vector<8xf32>
    %10 = vector.shape_cast %9 : vector<8xf32> to vector<8x1xf32>
    %cst_4 = arith.constant 3.200000e+01 : f32
    %11 = vector.broadcast %cst_4 : f32 to vector<8x1xf32>
    %12 = arith.divf %10, %11 : vector<8x1xf32>
    %13 = vector.broadcast %5 : vector<8x1xf32> to vector<8x32xf32>
    %14 = arith.subf %1, %13 : vector<8x32xf32>
    %cst_5 = arith.constant 9.99999974E-6 : f32
    %15 = vector.broadcast %cst_5 : f32 to vector<8x1xf32>
    %16 = arith.addf %12, %15 : vector<8x1xf32>
    %17 = math.rsqrt %16 : vector<8x1xf32>
    %18 = vector.broadcast %17 : vector<8x1xf32> to vector<8x32xf32>
    %19 = arith.mulf %14, %18 : vector<8x32xf32>
    %c0_6 = arith.constant 0 : index
    %c0_7 = arith.constant 0 : index
    %20 = vector.load %arg3[%c0_6, %c0_7] : memref<1x32xf32, #tpu.memory_space<vmem>>, vector<1x32xf32>
    %21 = vector.broadcast %20 : vector<1x32xf32> to vector<8x32xf32>
    %22 = arith.mulf %19, %21 : vector<8x32xf32>
    %c0_8 = arith.constant 0 : index
    %c0_9 = arith.constant 0 : index
    %23 = vector.load %arg4[%c0_8, %c0_9] : memref<1x32xf32, #tpu.memory_space<vmem>>, vector<1x32xf32>
    %24 = vector.broadcast %23 : vector<1x32xf32> to vector<8x32xf32>
    %25 = arith.addf %22, %24 : vector<8x32xf32>
    %c0_10 = arith.constant 0 : index
    %c0_11 = arith.constant 0 : index
    %26 = vector.load %arg5[%c0_10, %c0_11] : memref<32x96xf32, #tpu.memory_space<vmem>>, vector<32x96xf32>
    %cst_12 = arith.constant dense<0.000000e+00> : vector<8x96xf32>
    %27 = tpu.matmul %25, %26, %cst_12 {dimension_numbers = #tpu.dot_dimension_numbers<[1], [0], [0], [1], [0, 0, 1, 1], [], []>} : vector<8x32xf32>, vector<32x96xf32>, vector<8x96xf32> -> vector<8x96xf32>
    %c0_13 = arith.constant 0 : index
    %c0_14 = arith.constant 0 : index
    %28 = vector.load %arg6[%c0_13, %c0_14] : memref<1x96xf32, #tpu.memory_space<vmem>>, vector<1x96xf32>
    %29 = vector.broadcast %28 : vector<1x96xf32> to vector<8x96xf32>
    %30 = arith.addf %27, %29 : vector<8x96xf32>
    %31 = vector.extract_strided_slice %30 {offsets = [0, 0], sizes = [8, 32], strides = [1, 1]} : vector<8x96xf32> to vector<8x32xf32>
    %c0_15 = arith.constant 0 : index
    %c0_16 = arith.constant 0 : index
    %c0_17 = arith.constant 0 : index
    %32 = vector.load %arg7[%c0_15, %c0_16, %c0_17] : memref<1x8x32xf32, #tpu.memory_space<vmem>>, vector<1x8x32xf32>
    %33 = vector.shape_cast %32 : vector<1x8x32xf32> to vector<8x32xf32>
    %34 = vector.shape_cast %31 : vector<8x32xf32> to vector<1x8x32xf32>
    tpu.vector_store %arg7[%c0_15, %c0_16, %c0_17], %34 {strides = array<i32>} : memref<1x8x32xf32, #tpu.memory_space<vmem>>, vector<1x8x32xf32>,
    %35 = vector.extract_strided_slice %30 {offsets = [0, 32], sizes = [8, 32], strides = [1, 1]} : vector<8x96xf32> to vector<8x32xf32>
    %c0_18 = arith.constant 0 : index
    %c0_19 = arith.constant 0 : index
    %c0_20 = arith.constant 0 : index
    %36 = vector.load %arg8[%c0_18, %c0_19, %c0_20] : memref<1x8x32xf32, #tpu.memory_space<vmem>>, vector<1x8x32xf32>
    %37 = vector.shape_cast %36 : vector<1x8x32xf32> to vector<8x32xf32>
    %38 = vector.shape_cast %35 : vector<8x32xf32> to vector<1x8x32xf32>
    tpu.vector_store %arg8[%c0_18, %c0_19, %c0_20], %38 {strides = array<i32>} : memref<1x8x32xf32, #tpu.memory_space<vmem>>, vector<1x8x32xf32>,
    %39 = vector.extract_strided_slice %30 {offsets = [0, 64], sizes = [8, 32], strides = [1, 1]} : vector<8x96xf32> to vector<8x32xf32>
    %c0_21 = arith.constant 0 : index
    %c0_22 = arith.constant 0 : index
    %c0_23 = arith.constant 0 : index
    %40 = vector.load %arg9[%c0_21, %c0_22, %c0_23] : memref<1x8x32xf32, #tpu.memory_space<vmem>>, vector<1x8x32xf32>
    %41 = vector.shape_cast %40 : vector<1x8x32xf32> to vector<8x32xf32>
    %42 = vector.shape_cast %39 : vector<8x32xf32> to vector<1x8x32xf32>
    tpu.vector_store %arg9[%c0_21, %c0_22, %c0_23], %42 {strides = array<i32>} : memref<1x8x32xf32, #tpu.memory_space<vmem>>, vector<1x8x32xf32>,
    return
  }
  func.func @transform_0(%arg0: i32, %arg1: i32) -> (i32, i32, i32) {
    %c0_i32 = arith.constant 0 : i32
    %c0_i32_0 = arith.constant 0 : i32
    return %arg0, %arg1, %c0_i32 : i32, i32, i32
  }
  func.func @transform_1(%arg0: i32, %arg1: i32) -> (i32, i32) {
    %c0_i32 = arith.constant 0 : i32
    %c0_i32_0 = arith.constant 0 : i32
    %c0_i32_1 = arith.constant 0 : i32
    return %c0_i32, %c0_i32_0 : i32, i32
  }
  func.func @transform_2(%arg0: i32, %arg1: i32) -> (i32, i32) {
    %c0_i32 = arith.constant 0 : i32
    %c0_i32_0 = arith.constant 0 : i32
    %c0_i32_1 = arith.constant 0 : i32
    return %c0_i32, %c0_i32_0 : i32, i32
  }
  func.func @transform_3(%arg0: i32, %arg1: i32) -> (i32, i32) {
    %c0_i32 = arith.constant 0 : i32
    %c0_i32_0 = arith.constant 0 : i32
    %c0_i32_1 = arith.constant 0 : i32
    return %c0_i32, %c0_i32_0 : i32, i32
  }
  func.func @transform_4(%arg0: i32, %arg1: i32) -> (i32, i32) {
    %c0_i32 = arith.constant 0 : i32
    %c0_i32_0 = arith.constant 0 : i32
    %c0_i32_1 = arith.constant 0 : i32
    return %c0_i32, %c0_i32_0 : i32, i32
  }
  func.func @transform_5(%arg0: i32, %arg1: i32) -> (i32, i32, i32) {
    %c0_i32 = arith.constant 0 : i32
    %c0_i32_0 = arith.constant 0 : i32
    return %arg0, %arg1, %c0_i32 : i32, i32, i32
  }
  func.func @transform_6(%arg0: i32, %arg1: i32) -> (i32, i32, i32) {
    %c0_i32 = arith.constant 0 : i32
    %c0_i32_0 = arith.constant 0 : i32
    return %arg0, %arg1, %c0_i32 : i32, i32, i32
  }
  func.func @transform_7(%arg0: i32, %arg1: i32) -> (i32, i32, i32) {
    %c0_i32 = arith.constant 0 : i32
    %c0_i32_0 = arith.constant 0 : i32
    return %arg0, %arg1, %c0_i32 : i32, i32, i32
  }
}

</mosaic_0001>

<bundles_post_ra>
// kernel: tpu_custom_call.1
= control target key start
LH: loop header
LB: loop body
LE: loop exit
PB: predicated region body
PF: predicated region fallthrough
CT: control target
= control target key end

     0   :  { %s1283_s0 = inlined_call_operand.hbm [shape: f32[2,8,32], index: 0, kind: input, shape index: {}]   ;;  %s1284_s1 = inlined_call_operand.hbm [shape: f32[1,32], index: 1, kind: input, shape index: {}]   ;;  %s1285_s2 = inlined_call_operand.vmem [shape: f32[1,32], index: 2, kind: input, shape index: {}]   ;;  %s1286_s3 = inlined_call_operand.hbm [shape: f32[32,96], index: 3, kind: input, shape index: {}]   ;;  %s1287_s4 = inlined_call_operand.vmem [shape: f32[1,96], index: 4, kind: input, shape index: {}]   ;;  %s1288_s5 = inlined_call_operand.hbm [shape: f32[2,8,32], index: 5, kind: output, shape index: {0}]   ;;  %s1289_s6 = inlined_call_operand.hbm [shape: f32[2,8,32], index: 6, kind: output, shape index: {1}]   ;;  %s1290_s7 = inlined_call_operand.hbm [shape: f32[2,8,32], index: 7, kind: output, shape index: {2}]  }
   0x1   :  { %1292 = sst [smem:[#allocation16_spill]] %s1283_s0 }
   0x2   :  { %1293 = sst [smem:[#allocation17_spill]] %s1284_s1 }
   0x3   :  { %1294 = sst [smem:[#allocation18_spill]] %s1286_s3 }
   0x4   :  { %13 = vsyncpa [#allocation3], 0 }
   0x5   :  { %15 = vsyncpa [#allocation3 + $0x1], 0 }
   0x6   :  { %16 = vsyncpa [#allocation6], 0 }
   0x7   :  { %17 = vsyncpa [#allocation4], 0 }
   0x8   :  { %19 = vsyncpa [#allocation4 + $0x1], 0 }
   0x9   :  { %20 = vsyncpa [#allocation10], 0 }
   0xa   :  { %22 = vsyncpa [#allocation10 + $0x1], 0  ;;  %s1083_s24 = smov 0   ;;  %s1085_s25 = smov 0  }
   0xb   :  { %s1087_s26 = smov 0   ;;  %s1089_s27 = smov 0  }
   0xc   :  { %s1091_s28 = smov 0   ;;  %s1093_s29 = smov 0  }
   0xd LB: > { %s1114_s30 = sadd.s32 4294967295, %s1034_s29   ;;  %s1291_s8 = sadd.s32 4294967294, %s1034_s29   ;;  %s1034_s29 = sphi %s1093_s29, %s28_s29   ;;  %s1030_s28 = sphi %s1091_s28, %s1307_s28   ;;  %s1026_s27 = sphi %s1089_s27, %s1306_s27   ;;  %s1022_s26 = sphi %s1087_s26, %s1305_s26   ;;  %s1018_s25 = sphi %s1085_s25, %s1304_s25   ;;  %s1014_s24 = sphi %s1083_s24, %s1303_s24  }
   0xe   : > { %p62_p0 = scmp.ne.s32.totalorder %s1018_s25, %s1014_s24  ;;  %p63_p1 = scmp.eq.s32.totalorder %s1114_s30, 0 }
   0xf   : > { %p178_p2 = scmp.eq.s32.totalorder %s1291_s8, 1  ;;  %p671_p4 = scmp.ge.s32.totalorder %s1034_s29, 1 }
  0x10   : > { %p1124_p3 = por %p63_p1, %p62_p0  ;;  %p241_p6 = scmp.lt.s32.totalorder %s1034_s29, 3 }
  0x11   : > { %p1129_p5 = por %p178_p2, %p62_p0  ;;  %s1297_s1 = sld [smem:[#allocation17_spill]] }
  0x12   : > { %p1137_p7 = pnand %p671_p4, %p241_p6  ;;  %p674_p8 = scmp.ge.s32.totalorder %s1034_s29, 2 }
  0x13   : > { %s1036_s15 = smov [#allocation5]   ;;  %s1299_s3 = sld [smem:[#allocation18_spill]] }
  0x14   : > { %p709_p9 = pneg %p1137_p7  ;;  %s255_s16 = sshll.u32 %s1036_s15, 4  ;;  %s256_s16 = int_to_ptr.vmem [resolvable:$true] %s255_s16 }
  0x15   : > { %s1037_s20 = smov [#allocation7]   ;;  %s1038_s22 = smov 128  }
  0x16   : > { %p710_p10 = pnand %p709_p9, %p63_p1  ;;  %s269_s21 = sshll.u32 %s1037_s20, 4  ;;  %s270_s21 = int_to_ptr.vmem [resolvable:$true] %s269_s21 }
  0x17   : > { %s253_s13 = sshll.u32 %s1297_s1, 4  ;;  %s1039_s23 = smov 8   ;;  %s254_s13 = int_to_ptr.hbm [resolvable:$true] %s253_s13 }
  0x18   : > { %712 = dma.hbm_to_vmem [thread:$0]  (!%p710_p10), %s254_s13, 16, %s256_s16, [#allocation6]  }
  0x19   : > { %s267_s19 = sshll.u32 %s1299_s3, 4  ;;  %p172_p11 = scmp.eq.s32.totalorder %s1114_s30, 1  ;;  %s268_s19 = int_to_ptr.hbm [resolvable:$true] %s267_s19 }
  0x1a   : > { %715 = dma.hbm_to_vmem [thread:$0]  (!%p710_p10), %s268_s19, 512, %s270_s21, [#allocation6], %s1038_s22, %s1038_s22, %s1039_s23  }
  0x1b   : > { %s40_s11 = sadd.s32 1, %s1030_s28  ;;  %s49_s12 = sadd.s32 1, %s1022_s26 }
  0x1c   : > { %p42_p12 = scmp.ge.s32.totalorder %s40_s11, 2  ;;  %p56_p13 = scmp.ne.s32.totalorder %s1022_s26, %s1018_s25 }
  0x1d   : > { %p57_p0 = scmp.eq.s32.totalorder %s1034_s29, 0  ;;  %p732_p4 = scmp.lt.s32.totalorder %s1034_s29, 2 }
  0x1e   : > { %s1309_s11 = smov (%p42_p12, %s40_s11), 0  ;;  %p1157_p2 = por %p172_p11, %p56_p13 }
  0x1f   : > { %s44_s13 = ssub.s32 %s1030_s28, %s1309_s11  ;;  %s286_s16 = sand.u32 1, %s1022_s26  }
  0x20   : > { %p47_p6 = scmp.eq.s32.totalorder %s44_s13, 0  ;;  %p58_p9 = por %p57_p0, %p56_p13 }
  0x21   : > { %s675_s17 = sshll.u32 %s286_s16, 3  ;;  %s676_s18 = sshll.u32 %s1030_s28, 3 }
  0x22   : > { %s1167_s19 = scalar_select %p47_p6, %s1022_s26, %s49_s12  }
  0x23   : > { %s1301_s0 = sld [smem:[#allocation16_spill]]  ;;  %s290_s8 = scalar_lea.vmem [#allocation2], %s675_s17 }
  0x24   : > { %s299_s1 = sshll.u32 %s290_s8, 4  ;;  %p717_p10 = pnand %p732_p4, %p58_p9  ;;  %s300_s1 = int_to_ptr.vmem [resolvable:$true] %s299_s1 }
  0x25   : > { %s287_s3 = scalar_lea.sflag [#allocation3], %s286_s16  ;;  %s1177_s12 = sand.u32 (!%p1137_p7), 1, %s1018_s25  }
  0x26   : > { %s1180_s13 = sshll.u32 (!%p1137_p7), %s1177_s12, 3  ;;  %s311_s17 = scalar_lea.sflag (!%p1137_p7), [#allocation3], %s1177_s12 }
  0x27   : > { %308 = sbr.rel (%p1137_p7) target bundleno = 575 (0x23f), region = 40  ;;  %s314_s8 = scalar_lea.vmem (!%p1137_p7), [#allocation2], %s1180_s13 }
  0x29   : > { %s295_s22 = scalar_lea.hbm %s1301_s0, %s676_s18 }
  0x2a   : > { %s297_s23 = sshll.u32 %s295_s22, 4  ;;  %s298_s23 = int_to_ptr.hbm [resolvable:$true] %s297_s23 }
  0x2b   : > { %719 = dma.hbm_to_vmem [thread:$0]  (!%p717_p10), %s298_s23, 128, %s300_s1, %s287_s3  }
  0x2c   : > { %997 = dma.done.wait (%p1124_p3), %s311_s17, 128  }
  0x2d   : > { %999 = vsyncadd (%p1124_p3), %s311_s17, 4294967168 }
  0x2e   : > { %1001 = dma.done.wait (%p63_p1), [#allocation6], 528  }
  0x2f   : > { %1003 = vsyncadd (%p63_p1), [#allocation6], 4294966768  ;;  %vm367_vm0 = vcmask 261120   ;;  %v366_v0 = vld [vmem:[%s314_s8] sm:$0xff]  ;;  %v1040_v2 = vmov 32.0   ;;  %v407_v17 = vld [vmem:[#allocation7] sm:$0xff] }
  0x30   : > { %v368_v1 = vsel %vm367_vm0, %v366_v0, 0.0  ;;  %794 = vrcp.f32 %v1040_v2  ;;  %v410_v14 = vld [vmem:[#allocation7 + $0x18] sm:$0xff]  ;;  %v409_v15 = vld [vmem:[#allocation7 + $0x10] sm:$0xff]  ;;  %v408_v16 = vld [vmem:[#allocation7 + $0x8] sm:$0xff]  ;;  %s1199_s9 = sshll.u32 %s1026_s27, 3  ;;  %s351_s22 = scalar_lea.vmem [#allocation8], %s1180_s13 }
  0x31   : > { %369 = vadd.xlane.f32.xlu0 %v368_v1  ;;  %430 = vmatpush.msra.mxu0 %v410_v14  ;;  %v791_v27 = vld [vmem:[#allocation5] ss:$0 sm:$0xff]  ;;  %v792_v30 = vld [vmem:[%s1285_s2] ss:$0 sm:$0xff]  ;;  %s470_s21 = scalar_lea.hbm %s1288_s5, %s1199_s9  ;;  %s472_s23 = sshll.u32 %s351_s22, 4  ;;  %s473_s23 = int_to_ptr.vmem [resolvable:$true] %s472_s23 }
  0x32   : > { %v793_v33 = vld [vmem:[%s1287_s4] ss:$0 sm:$0xff]  ;;  %s474_s17 = sshll.u32 %s470_s21, 4  ;;  %s1041_s8 = smov 96   ;;  %s475_s17 = int_to_ptr.hbm [resolvable:$true] %s474_s17 }
  0x33   : > { %431 = vmatpush.msra.mxu0 %v409_v15  ;;  %s449_s27 = scalar_lea.sflag [#allocation4], %s1177_s12  ;;  %s902_s1 = sshra.s32 %s475_s17, 4  ;;  %s903_s1 = int_to_ptr.hbm [resolvable:$true] %s902_s1 }
  0x34   : > { %s904_s3 = scalar_lea.hbm %s903_s1, 8  ;;  %s908_s18 = scalar_lea.hbm %s1288_s5, 16 }
  0x35   : > { %432 = vmatpush.msra.mxu0 %v408_v16  ;;  %p905_p1 = scmp.ne.s32.totalorder %s903_s1, %s904_s3  ;;  %p909_p11 = scmp.lt.s32.totalorder %s903_s1, %s1288_s5 }
  0x36   : > { %v795_v3 = vpop.eup %794  ;;  %p910_p12 = scmp.lt.s32.totalorder %s908_s18, %s904_s3 }
  0x37   : > { %v372_v4 = vmul.f32 32.0, %v795_v3  ;;  %vm376_vm1 = vweird.f32 %v795_v3  ;;  %433 = vmatpush.msra.mxu0 %v407_v17  ;;  %p906_p3 = pnand %p905_p1, %p1157_p2 }
  0x38   : > { %p911_p13 = por %p910_p12, %p909_p11 }
  0x39   : > { %v373_v5 = vsub.f32 1.0, %v372_v4  ;;  %p907_p7 = pneg %p906_p3 }
  0x3b   : > { %v374_v6 = vmul.f32 %v795_v3, %v373_v5  ;;  %p912_p0 = pnand %p911_p13, %p907_p7 }
  0x3d   : > { %v375_v7 = vadd.f32 %v795_v3, %v374_v6 }
  0x3f   : > { %v377_v8 = vsel %vm376_vm1, %v795_v3, %v375_v7 }
  0xa4   : > { %v370_v9 = vpop.xlane.xlu0 %369 }
  0xa5   : > { %v378_v10 = vmul.f32 %v377_v8, %v370_v9 }
  0xa7   : > { %v379_v11 = vsub.f32 %v366_v0, %v378_v10 }
  0xa9   : > { %v380_v12 = vmul.f32 %v379_v11, %v379_v11 }
  0xab   : > { %v381_v13 = vsel %vm367_vm0, %v380_v12, 0.0 }
  0xac   : > { %382 = vadd.xlane.f32.xlu0 %v381_v13 }
 0x11f   : > { %v383_v18 = vpop.xlane.xlu0 %382 }
 0x120   : > { %v384_v19 = vmul.f32 %v383_v18, %v377_v8 }
 0x122   : > { %v385_v20 = vadd.f32 1e-05, %v384_v19 }
 0x124   : > { %796 = vrsqrt.f32 %v385_v20  ;;  %vm392_vm3 = vweird.f32 %v385_v20 }
 0x12a   : > { %v797_v21 = vpop.eup %796 }
 0x12b   : > { %v387_v22 = vmul.f32 %v797_v21, %v385_v20  ;;  %vm393_vm2 = vweird.f32 %v797_v21 }
 0x12c   : > { %vm394_vm4 = vmor %vm392_vm3, %vm393_vm2 }
 0x12d   : > { %v388_v23 = vmul.f32 %v797_v21, %v387_v22 }
 0x12f   : > { %v389_v24 = vmul.f32 0.5, %v388_v23 }
 0x131   : > { %v390_v25 = vsub.f32 1.5, %v389_v24 }
 0x133   : > { %v391_v26 = vmul.f32 %v797_v21, %v390_v25 }
 0x135   : > { %v395_v28 = vsel %vm394_vm4, %v797_v21, %v391_v26 }
 0x136   : > { %v396_v29 = vmul.f32 %v395_v28, %v379_v11 }
 0x138   : > { %v401_v31 = vmul.f32 %v791_v27, %v396_v29 }
 0x13a   : > { %v406_v32 = vadd.f32 %v792_v30, %v401_v31 }
 0x13c   : > { %684 = vmatmul.msk.f32.vlgmr.msra.gmra.mxu0 %vm367_vm0, %v406_v32 }
 0x1b9   : > { %v435_v34 = vpop.f32.mrf.mxu0 }
 0x1ba   : > { %v436_v35 = vadd.f32 %v793_v33, %v435_v34 }
 0x1bc   : > { %440 = vrot.lane.b32.xlu1 %v436_v35, %s1041_s8  ;;  %438 = vst.msk [vmem:[%s351_s22] sm:$0xff] %vm367_vm0, %v436_v35 }
 0x1bd   : > { %915 = shalt.err (!%p912_p0)
}
 0x1be   : > { %703 = dma.vmem_to_hbm [thread:$0]  (%p1157_p2), %s473_s23, 128, %s475_s17, %s449_s27  }
 0x1bf   : > { %s1042_s12 = smov 64   ;;  %s485_s14 = scalar_lea.hbm %s1289_s6, %s1199_s9 }
 0x1c0   : > { %s453_s16 = sand.u32 1, %s1114_s30   ;;  %s358_s1 = scalar_lea.vmem [#allocation9], %s1180_s13 }
 0x1c1   : > { %s487_s3 = sshll.u32 %s358_s1, 4  ;;  %s489_s18 = sshll.u32 %s485_s14, 4  ;;  %s488_s3 = int_to_ptr.vmem [resolvable:$true] %s487_s3  ;;  %s490_s18 = int_to_ptr.hbm [resolvable:$true] %s489_s18 }
 0x1c2   : > { %s500_s23 = scalar_lea.hbm %s1290_s7, %s1199_s9  ;;  %s1232_s17 = scalar_lea.sflag [#allocation10], %s453_s16 }
 0x1c3   : > { %s930_s27 = sshra.s32 %s490_s18, 4  ;;  %s936_s8 = scalar_lea.hbm %s1289_s6, 16  ;;  %s931_s27 = int_to_ptr.hbm [resolvable:$true] %s930_s27 }
 0x1c4   : > { %444 = vrot.lane.b32.xlu1 %v436_v35, %s1042_s12  ;;  %s932_s12 = scalar_lea.hbm %s931_s27, 8  ;;  %p937_p10 = scmp.lt.s32.totalorder %s931_s27, %s1289_s6 }
 0x1c5   : > { %p933_p4 = scmp.ne.s32.totalorder %s931_s27, %s932_s12  ;;  %p938_p1 = scmp.lt.s32.totalorder %s936_s8, %s932_s12 }
 0x1c7   : > { %p934_p6 = pnand %p933_p4, %p1157_p2  ;;  %p939_p3 = por %p938_p1, %p937_p10 }
 0x1c9   : > { %p935_p9 = pneg %p934_p6 }
 0x1cb   : > { %p940_p7 = pnand %p939_p3, %p935_p9 }
 0x22e   : > { %v441_v36 = vpop.permute.xlu1 %440 }
 0x22f   : > { %443 = vst.msk [vmem:[%s358_s1] sm:$0xff] %vm367_vm0, %v441_v36 }
 0x230   : > { %943 = shalt.err (!%p940_p7)
}
 0x231   : > { %704 = dma.vmem_to_hbm [thread:$0]  (%p1157_p2), %s488_s3, 128, %s490_s18, %s1232_s17  }
 0x232   : > { %s365_s9 = scalar_lea.vmem [#allocation11], %s1180_s13  ;;  %s504_s1 = sshll.u32 %s500_s23, 4  ;;  %s505_s1 = int_to_ptr.hbm [resolvable:$true] %s504_s1 }
 0x233   : > { %s502_s16 = sshll.u32 %s365_s9, 4  ;;  %s958_s0 = sshra.s32 %s505_s1, 4  ;;  %s503_s16 = int_to_ptr.vmem [resolvable:$true] %s502_s16  ;;  %s959_s0 = int_to_ptr.hbm [resolvable:$true] %s958_s0 }
 0x234   : > { %s960_s20 = scalar_lea.hbm %s959_s0, 8  ;;  %s964_s12 = scalar_lea.hbm %s1290_s7, 16 }
 0x235   : > { %p961_p11 = scmp.ne.s32.totalorder %s959_s0, %s960_s20  ;;  %p965_p0 = scmp.lt.s32.totalorder %s959_s0, %s1290_s7 }
 0x236   : > { %v445_v37 = vpop.permute.xlu1 %444  ;;  %p966_p4 = scmp.lt.s32.totalorder %s964_s12, %s960_s20 }
 0x237   : > { %447 = vst.msk [vmem:[%s365_s9] sm:$0xff] %vm367_vm0, %v445_v37  ;;  %p962_p12 = pnand %p961_p11, %p1157_p2 }
 0x238   : > { %p967_p6 = por %p966_p4, %p965_p0 }
 0x239   : > { %p963_p13 = pneg %p962_p12 }
 0x23b   : > { %p968_p9 = pnand %p967_p6, %p963_p13 }
 0x23d   : > { %971 = shalt.err (!%p968_p9)
}
 0x23e   : > { %705 = dma.vmem_to_hbm [thread:$0]  (%p1157_p2), %s503_s16, 128, %s505_s1, %s1232_s17  }
 0x23f PF: > { %s516_s18 = sand.u32 1, %s1014_s24   ;;  %p721_p10 = pnand %p674_p8, %p1129_p5 }
 0x240   : > { %s517_s23 = scalar_lea.sflag [#allocation4], %s516_s18 }
 0x241   : > { %p722_p1 = pneg %p721_p10 }
 0x243   : > { %1005 = dma.done.wait (%p722_p1), %s517_s23, 128  }
 0x244   : > { %1007 = vsyncadd (%p722_p1), %s517_s23, 4294967168  ;;  %s1302_s30 = sadd.s32 4294967294, %s1034_s29  }
 0x245   : > { %s526_s22 = sand.u32 1, %s1302_s30  }
 0x246   : > { %s527_s8 = scalar_lea.sflag [#allocation10], %s526_s22 }
 0x247   : > { %1009 = dma.done.wait (%p722_p1), %s527_s8, 256  }
 0x248   : > { %1011 = vsyncadd (%p722_p1), %s527_s8, 4294967040  ;;  %s28_s29 = sadd.s32 1, %s1034_s29   ;;  %s1303_s24 = smov %s1018_s25 }
 0x249   : > { %p25_p2 = scmp.ge.s32.totalorder %s28_s29, 4   ;;  %s1304_s25 = smov %s1022_s26 }
 0x24a   : > { %s1305_s26 = smov %s1167_s19  ;;  %s1306_s27 = smov %s1030_s28 }
 0x24b   : > { %s1307_s28 = smov %s1309_s11  ;;  %27 = sbr.rel (!%p25_p2) target bundleno = 13 (0xd), region = 125 }
 0x250   :  { %543 = vsyncpa [#allocation3], 1 }
 0x251   :  { %545 = vsyncpa [#allocation3 + $0x1], 1 }
 0x252   :  { %546 = vsyncpa [#allocation6], 1 }
 0x253   :  { %547 = vsyncpa [#allocation4], 1 }
 0x254   :  { %549 = vsyncpa [#allocation4 + $0x1], 1 }
 0x255   :  { %550 = vsyncpa [#allocation10], 1 }
 0x256   :  { %552 = vsyncpa [#allocation10 + $0x1], 1 }

</bundles_post_ra>
